<compile_context>
chip_gen: v7x
topology: tpu7x:2x2x1
jax: 0.10.0
libtpu: 0.0.40
codegen_flags: <defaults>
</compile_context>

<pallas_src>
import jax
import jax.numpy as jnp
from jax.experimental import pallas as pl
from jax.experimental.pallas import tpu as pltpu

IN_FEATURES = 768
OUT_FEATURES = 14


def _round_up(x, m):
    return ((x + m - 1) // m) * m


def _tile_config(batch):
    """Pick (tile_m, vmem_limit_bytes) per TPU generation.

    v5e : 1024 rows (2x3 MiB x buffers fit the 16 MiB scoped VMEM default)
    v6e : 2048 rows (~15 MiB, fits the 32 MiB default, halves step overhead)
    v7x : up to 4096 rows with an explicit 48 MiB VMEM limit (64 MiB physical),
          capped so there are >= 2 grid steps for 2-TensorCore sharding.
    """
    try:
        kind = jax.devices()[0].device_kind.lower()
    except Exception:  # pragma: no cover - defensive fallback
        kind = ""

    if "v7" in kind:
        max_tile, vmem_limit, two_core = 4096, 48 << 20, True
    elif "v6" in kind:
        max_tile, vmem_limit, two_core = 2048, None, False
    else:
        # v5e / v5p / unknown: 1024-row tiles fit every scoped-VMEM default.
        max_tile, vmem_limit, two_core = 1024, None, False

    tile_m = min(max_tile, _round_up(batch, 8))
    if two_core and batch > 8:
        # Keep at least one tile per TensorCore on v7x.
        tile_m = min(tile_m, _round_up(pl.cdiv(batch, 2), 8))
    tile_m = max(tile_m, 8)
    return tile_m, vmem_limit


def linear_kernel(x_ref, w_ref, b_ref, o_ref):
    # MXU matmul with f32 accumulation; bias add is VPU filler under the
    # DMA/MXU critical path.
    acc = jnp.dot(x_ref[...], w_ref[...], preferred_element_type=jnp.float32)
    o_ref[...] = (acc + b_ref[...]).astype(o_ref.dtype)


def prepare_params(weight, bias):
    """One-time parameter repack (hoisted out of the per-call path).

    weight: (14, 768) torch-Linear layout -> (768, 14)
    bias:   (14,)                          -> (1, 14)
    """
    w_t = weight.T.astype(jnp.float32)
    b2d = bias.reshape(1, OUT_FEATURES).astype(jnp.float32)
    return w_t, b2d


def placeholder_model_forward(x, w_t, b2d):
    """Forward of PlaceholderModel: x @ weight.T + bias.

    x:   (B, 768) f32
    w_t: (768, 14) f32  (pre-transposed, from prepare_params)
    b2d: (1, 14)   f32
    returns (B, 14) f32
    """
    B = x.shape[0]
    assert x.shape[1] == IN_FEATURES
    x = x.astype(jnp.float32)

    tile_m, vmem_limit = _tile_config(B)
    grid_m = pl.cdiv(B, tile_m)  # ragged last block: padded reads, masked writes

    cp_kwargs = dict(dimension_semantics=("parallel",))
    if vmem_limit is not None:
        cp_kwargs["vmem_limit_bytes"] = vmem_limit

    out = pl.pallas_call(
        linear_kernel,
        out_shape=jax.ShapeDtypeStruct((B, OUT_FEATURES), jnp.float32),
        grid_spec=pltpu.PrefetchScalarGridSpec(
            num_scalar_prefetch=0,
            grid=(grid_m,),
            in_specs=[
                # x: streamed batch tiles, double-buffered by the pipeline.
                pl.BlockSpec((tile_m, IN_FEATURES), lambda i: (i, 0)),
                # weight / bias: constant index map -> VMEM-resident.
                pl.BlockSpec((IN_FEATURES, OUT_FEATURES), lambda i: (0, 0)),
                pl.BlockSpec((1, OUT_FEATURES), lambda i: (0, 0)),
            ],
            out_specs=pl.BlockSpec((tile_m, OUT_FEATURES), lambda i: (i, 0)),
        ),
        compiler_params=pltpu.CompilerParams(**cp_kwargs),
    )(x, w_t, b2d)

    return out


if __name__ == "__main__":
    key = jax.random.PRNGKey(0)
    kx, kw, kb = jax.random.split(key, 3)

    # Small batch, deliberately not a multiple of 8 to exercise the ragged
    # edge-block path (padded reads / masked writes on the last tile).
    B = 37
    x = jax.random.normal(kx, (B, IN_FEATURES), dtype=jnp.float32)

    # Deterministic synthetic parameters (torch Linear: weight (14,768), bias (14,)).
    bound = 1.0 / (IN_FEATURES ** 0.5)
    weight = jax.random.uniform(
        kw, (OUT_FEATURES, IN_FEATURES), dtype=jnp.float32, minval=-bound, maxval=bound
    )
    bias = jax.random.uniform(
        kb, (OUT_FEATURES,), dtype=jnp.float32, minval=-bound, maxval=bound
    )

    # One-time parameter repack (kept out of the per-call path).
    w_t, b2d = prepare_params(weight, bias)

    out = placeholder_model_forward(x, w_t, b2d)
    out = jax.block_until_ready(out)

    # Reference check against plain JAX (matches torch's x @ W.T + b).
    ref = x @ weight.T + bias
    assert out.shape == (B, OUT_FEATURES)
    assert jnp.allclose(out, ref, atol=1e-4, rtol=1e-4)

    print("KERNEL_OK")
</pallas_src>

<mosaic_0001>
module attributes {stable_mosaic.version = 11 : i64} {
  func.func @linear_kernel(%arg0: i32, %arg1: memref<40x768xf32, #tpu.memory_space<vmem>>, %arg2: memref<768x14xf32, #tpu.memory_space<vmem>>, %arg3: memref<1x14xf32, #tpu.memory_space<vmem>>, %arg4: memref<40x14xf32, #tpu.memory_space<vmem>>) attributes {dimension_semantics = [#tpu.dimension_semantics<parallel>], iteration_bounds = array<i64: 1>, scalar_prefetch = 0 : i64, scratch_operands = 0 : i64, tpu.core_type = #tpu.core_type<tc>, window_params = [{transform_indices = @transform_0, window_bounds = array<i64: 40, 768>}, {pipeline_mode = #tpu.pipeline_mode<synchronous>, transform_indices = @transform_1, window_bounds = array<i64: 768, 14>}, {pipeline_mode = #tpu.pipeline_mode<synchronous>, transform_indices = @transform_2, window_bounds = array<i64: 1, 14>}, {transform_indices = @transform_3, window_bounds = array<i64: 40, 14>}]} {
    %c0 = arith.constant 0 : index
    %c0_0 = arith.constant 0 : index
    %0 = vector.load %arg1[%c0, %c0_0] : memref<40x768xf32, #tpu.memory_space<vmem>>, vector<40x768xf32>
    %c0_1 = arith.constant 0 : index
    %c0_2 = arith.constant 0 : index
    %1 = vector.load %arg2[%c0_1, %c0_2] : memref<768x14xf32, #tpu.memory_space<vmem>>, vector<768x14xf32>
    %cst = arith.constant dense<0.000000e+00> : vector<40x14xf32>
    %2 = tpu.matmul %0, %1, %cst {dimension_numbers = #tpu.dot_dimension_numbers<[1], [0], [0], [1], [0, 0, 1, 1], [], []>} : vector<40x768xf32>, vector<768x14xf32>, vector<40x14xf32> -> vector<40x14xf32>
    %c0_3 = arith.constant 0 : index
    %c0_4 = arith.constant 0 : index
    %3 = vector.load %arg3[%c0_3, %c0_4] : memref<1x14xf32, #tpu.memory_space<vmem>>, vector<1x14xf32>
    %4 = vector.broadcast %3 : vector<1x14xf32> to vector<40x14xf32>
    %5 = arith.addf %2, %4 : vector<40x14xf32>
    %c0_5 = arith.constant 0 : index
    %c0_6 = arith.constant 0 : index
    %6 = vector.load %arg4[%c0_5, %c0_6] : memref<40x14xf32, #tpu.memory_space<vmem>>, vector<40x14xf32>
    tpu.vector_store %arg4[%c0_5, %c0_6], %5 {strides = array<i32>} : memref<40x14xf32, #tpu.memory_space<vmem>>, vector<40x14xf32>,
    return
  }
  func.func @transform_0(%arg0: i32) -> (i32, i32) {
    %c0_i32 = arith.constant 0 : i32
    %c0_i32_0 = arith.constant 0 : i32
    return %arg0, %c0_i32 : i32, i32
  }
  func.func @transform_1(%arg0: i32) -> (i32, i32) {
    %c0_i32 = arith.constant 0 : i32
    %c0_i32_0 = arith.constant 0 : i32
    %c0_i32_1 = arith.constant 0 : i32
    return %c0_i32, %c0_i32_0 : i32, i32
  }
  func.func @transform_2(%arg0: i32) -> (i32, i32) {
    %c0_i32 = arith.constant 0 : i32
    %c0_i32_0 = arith.constant 0 : i32
    %c0_i32_1 = arith.constant 0 : i32
    return %c0_i32, %c0_i32_0 : i32, i32
  }
  func.func @transform_3(%arg0: i32) -> (i32, i32) {
    %c0_i32 = arith.constant 0 : i32
    %c0_i32_0 = arith.constant 0 : i32
    return %arg0, %c0_i32 : i32, i32
  }
}

</mosaic_0001>

<bundles_post_ra>
// kernel: tpu_custom_call.1
= control target key start
LH: loop header
LB: loop body
LE: loop exit
PB: predicated region body
PF: predicated region fallthrough
CT: control target
= control target key end

     0   :  { %vm417_vm0 = vcmask 113664   ;;  %s1102_s1 = inlined_call_operand.vmem [shape: f32[768,14], index: 1, kind: input, shape index: {}]   ;;  %s1103_s0 = inlined_call_operand.vmem [shape: f32[37,768], index: 0, kind: input, shape index: {}]   ;;  %s1104_s2 = inlined_call_operand.vmem [shape: f32[1,14], index: 2, kind: input, shape index: {}]   ;;  %s1105_s3 = inlined_call_operand.vmem [shape: f32[37,14], index: 3, kind: output, shape index: {}]  }
   0x1   :  { %v60_v0 = vld [vmem:[%s1102_s1 + $0x80] sm:$0xff]  ;;  %v61_v1 = vld [vmem:[%s1102_s1 + $0x88] sm:$0xff]  ;;  %v62_v11 = vld [vmem:[%s1102_s1 + $0x90] sm:$0xff] }
   0x2   :  { %v92_v2 = vld [vmem:[%s1102_s1 + $0x180] sm:$0xff]  ;;  %v569_v3 = vpack.c.bf16 %v61_v1, %v60_v0  ;;  %v93_v4 = vld [vmem:[%s1102_s1 + $0x188] sm:$0xff]  ;;  %v63_v13 = vld [vmem:[%s1102_s1 + $0x98] sm:$0xff] }
   0x3   :  { %v44_v5 = vld [vmem:[%s1102_s1] sm:$0xff]  ;;  %v45_v6 = vld [vmem:[%s1102_s1 + $0x8] sm:$0xff]  ;;  %v601_v7 = vpack.c.bf16 %v93_v4, %v92_v2  ;;  %v94_v14 = vld [vmem:[%s1102_s1 + $0x190] sm:$0xff]  ;;  %v573_v16 = vpack.c.bf16 %v63_v13, %v62_v11 }
   0x4   :  { %v571_v8 = vpack.c.bf16 %v45_v6, %v44_v5  ;;  %v76_v9 = vld [vmem:[%s1102_s1 + $0x100] sm:$0xff]  ;;  %v77_v10 = vld [vmem:[%s1102_s1 + $0x108] sm:$0xff]  ;;  %570 = vmatprep.subr.bf16.mxu0 %v569_v3  ;;  %v95_v15 = vld [vmem:[%s1102_s1 + $0x198] sm:$0xff] }
   0x5   :  { %v603_v12 = vpack.c.bf16 %v77_v10, %v76_v9  ;;  %602 = vmatprep.subr.bf16.mxu1 %v601_v7  ;;  %v605_v17 = vpack.c.bf16 %v95_v15, %v94_v14  ;;  %v46_v18 = vld [vmem:[%s1102_s1 + $0x10] sm:$0xff]  ;;  %v47_v19 = vld [vmem:[%s1102_s1 + $0x18] sm:$0xff]  ;;  %v64_v23 = vld [vmem:[%s1102_s1 + $0xa0] sm:$0xff] }
   0x6   :  { %572 = vmatpush3.bf16.msra.mxu0 %v571_v8  ;;  %v78_v20 = vld [vmem:[%s1102_s1 + $0x110] sm:$0xff]  ;;  %v575_v21 = vpack.c.bf16 %v47_v19, %v46_v18  ;;  %v79_v22 = vld [vmem:[%s1102_s1 + $0x118] sm:$0xff]  ;;  %v65_v24 = vld [vmem:[%s1102_s1 + $0xa8] sm:$0xff] }
   0x7   :  { %604 = vmatpush3.bf16.msra.mxu1 %v603_v12  ;;  %574 = vmatprep.subr.bf16.mxu0 %v573_v16  ;;  %v607_v25 = vpack.c.bf16 %v79_v22, %v78_v20  ;;  %v577_v26 = vpack.c.bf16 %v65_v24, %v64_v23  ;;  %v96_v27 = vld [vmem:[%s1102_s1 + $0x1a0] sm:$0xff]  ;;  %v97_v28 = vld [vmem:[%s1102_s1 + $0x1a8] sm:$0xff]  ;;  %v66_v35 = vld [vmem:[%s1102_s1 + $0xb0] sm:$0xff] }
   0x8   :  { %606 = vmatprep.subr.bf16.mxu1 %v605_v17  ;;  %v48_v29 = vld [vmem:[%s1102_s1 + $0x20] sm:$0xff]  ;;  %v609_v30 = vpack.c.bf16 %v97_v28, %v96_v27  ;;  %v49_v31 = vld [vmem:[%s1102_s1 + $0x28] sm:$0xff]  ;;  %v67_v36 = vld [vmem:[%s1102_s1 + $0xb8] sm:$0xff] }
   0x9   :  { %v80_v32 = vld [vmem:[%s1102_s1 + $0x120] sm:$0xff]  ;;  %v81_v33 = vld [vmem:[%s1102_s1 + $0x128] sm:$0xff]  ;;  %v579_v34 = vpack.c.bf16 %v49_v31, %v48_v29  ;;  %v98_v37 = vld [vmem:[%s1102_s1 + $0x1b0] sm:$0xff]  ;;  %v581_v39 = vpack.c.bf16 %v67_v36, %v66_v35 }
   0xa   :  { %576 = vmatpush3.bf16.msra.mxu0 %v575_v21  ;;  %v611_v38 = vpack.c.bf16 %v81_v33, %v80_v32  ;;  %v99_v40 = vld [vmem:[%s1102_s1 + $0x1b8] sm:$0xff]  ;;  %v50_v41 = vld [vmem:[%s1102_s1 + $0x30] sm:$0xff]  ;;  %v68_v46 = vld [vmem:[%s1102_s1 + $0xc0] sm:$0xff] }
   0xb   :  { %608 = vmatpush3.bf16.msra.mxu1 %v607_v25  ;;  %578 = vmatprep.subr.bf16.mxu0 %v577_v26  ;;  %v51_v42 = vld [vmem:[%s1102_s1 + $0x38] sm:$0xff]  ;;  %v613_v43 = vpack.c.bf16 %v99_v40, %v98_v37  ;;  %v82_v44 = vld [vmem:[%s1102_s1 + $0x130] sm:$0xff]  ;;  %v69_v47 = vld [vmem:[%s1102_s1 + $0xc8] sm:$0xff] }
   0xc   :  { %610 = vmatprep.subr.bf16.mxu1 %v609_v30  ;;  %v83_v45 = vld [vmem:[%s1102_s1 + $0x138] sm:$0xff]  ;;  %v100_v48 = vld [vmem:[%s1102_s1 + $0x1c0] sm:$0xff]  ;;  %v101_v49 = vld [vmem:[%s1102_s1 + $0x1c8] sm:$0xff]  ;;  %v583_v50 = vpack.c.bf16 %v51_v42, %v50_v41  ;;  %v585_v52 = vpack.c.bf16 %v69_v47, %v68_v46 }
   0xd   :  { %v615_v51 = vpack.c.bf16 %v83_v45, %v82_v44  ;;  %v52_v53 = vld [vmem:[%s1102_s1 + $0x40] sm:$0xff]  ;;  %v53_v54 = vld [vmem:[%s1102_s1 + $0x48] sm:$0xff]  ;;  %v617_v56 = vpack.c.bf16 %v101_v49, %v100_v48  ;;  %v70_v58 = vld [vmem:[%s1102_s1 + $0xd0] sm:$0xff] }
   0xe   :  { %580 = vmatpush3.bf16.msra.mxu0 %v579_v34  ;;  %v84_v55 = vld [vmem:[%s1102_s1 + $0x140] sm:$0xff]  ;;  %v85_v57 = vld [vmem:[%s1102_s1 + $0x148] sm:$0xff]  ;;  %v71_v59 = vld [vmem:[%s1102_s1 + $0xd8] sm:$0xff]  ;;  %v587_v62 = vpack.c.bf16 %v53_v54, %v52_v53 }
   0xf   :  { %612 = vmatpush3.bf16.msra.mxu1 %v611_v38  ;;  %582 = vmatprep.subr.bf16.mxu0 %v581_v39  ;;  %v102_v60 = vld [vmem:[%s1102_s1 + $0x1d0] sm:$0xff]  ;;  %v103_v61 = vld [vmem:[%s1102_s1 + $0x1d8] sm:$0xff]  ;;  %v619_v63 = vpack.c.bf16 %v85_v57, %v84_v55  ;;  %v589_v0 = vpack.c.bf16 %v71_v59, %v70_v58  ;;  %v72_v6 = vld [vmem:[%s1102_s1 + $0xe0] sm:$0xff] }
  0x10   :  { %614 = vmatprep.subr.bf16.mxu1 %v613_v43  ;;  %v54_v1 = vld [vmem:[%s1102_s1 + $0x50] sm:$0xff]  ;;  %v55_v2 = vld [vmem:[%s1102_s1 + $0x58] sm:$0xff]  ;;  %v621_v4 = vpack.c.bf16 %v103_v61, %v102_v60  ;;  %v73_v7 = vld [vmem:[%s1102_s1 + $0xe8] sm:$0xff] }
  0x11   :  { %v86_v3 = vld [vmem:[%s1102_s1 + $0x150] sm:$0xff]  ;;  %v87_v5 = vld [vmem:[%s1102_s1 + $0x158] sm:$0xff]  ;;  %v104_v8 = vld [vmem:[%s1102_s1 + $0x1e0] sm:$0xff]  ;;  %v591_v10 = vpack.c.bf16 %v55_v2, %v54_v1  ;;  %v593_v14 = vpack.c.bf16 %v73_v7, %v72_v6 }
  0x12   :  { %584 = vmatpush3.bf16.msra.mxu0 %v583_v50  ;;  %v105_v9 = vld [vmem:[%s1102_s1 + $0x1e8] sm:$0xff]  ;;  %v56_v11 = vld [vmem:[%s1102_s1 + $0x60] sm:$0xff]  ;;  %v623_v13 = vpack.c.bf16 %v87_v5, %v86_v3  ;;  %v74_v19 = vld [vmem:[%s1102_s1 + $0xf0] sm:$0xff] }
  0x13   :  { %616 = vmatpush3.bf16.msra.mxu1 %v615_v51  ;;  %586 = vmatprep.subr.bf16.mxu0 %v585_v52  ;;  %v57_v12 = vld [vmem:[%s1102_s1 + $0x68] sm:$0xff]  ;;  %v88_v15 = vld [vmem:[%s1102_s1 + $0x160] sm:$0xff]  ;;  %v625_v18 = vpack.c.bf16 %v105_v9, %v104_v8  ;;  %v75_v20 = vld [vmem:[%s1102_s1 + $0xf8] sm:$0xff] }
  0x14   :  { %618 = vmatprep.subr.bf16.mxu1 %v617_v56  ;;  %v89_v16 = vld [vmem:[%s1102_s1 + $0x168] sm:$0xff]  ;;  %v17_v21 = vld [vmem:[%s1103_s0 + $0x18] sm:$0xff]  ;;  %v106_v22 = vld [vmem:[%s1102_s1 + $0x1f0] sm:$0xff]  ;;  %v595_v24 = vpack.c.bf16 %v57_v12, %v56_v11  ;;  %v597_v26 = vpack.c.bf16 %v75_v20, %v74_v19 }
  0x15   :  { %v15_v17 = vld [vmem:[%s1103_s0 + $0x8] sm:$0xff]  ;;  %v107_v23 = vld [vmem:[%s1102_s1 + $0x1f8] sm:$0xff]  ;;  %301 = vmatprep.mubr.f32.mxu1 %v17_v21  ;;  %v627_v25 = vpack.c.bf16 %v89_v16, %v88_v15  ;;  %v58_v27 = vld [vmem:[%s1102_s1 + $0x70] sm:$0xff] }
  0x16   :  { %588 = vmatpush3.bf16.msra.mxu0 %v587_v62  ;;  %211 = vmatprep.mubr.f32.mxu0 %v15_v17  ;;  %v59_v28 = vld [vmem:[%s1102_s1 + $0x78] sm:$0xff]  ;;  %v90_v29 = vld [vmem:[%s1102_s1 + $0x170] sm:$0xff]  ;;  %v629_v30 = vpack.c.bf16 %v107_v23, %v106_v22  ;;  %v124_v32 = vld [vmem:[%s1102_s1 + $0x280] sm:$0xff] }
  0x17   :  { %620 = vmatpush3.bf16.msra.mxu1 %v619_v63  ;;  %590 = vmatprep.subr.bf16.mxu0 %v589_v0  ;;  %v91_v31 = vld [vmem:[%s1102_s1 + $0x178] sm:$0xff]  ;;  %v125_v33 = vld [vmem:[%s1102_s1 + $0x288] sm:$0xff]  ;;  %v599_v34 = vpack.c.bf16 %v59_v28, %v58_v27  ;;  %v108_v37 = vld [vmem:[%s1102_s1 + $0x200] sm:$0xff] }
  0x18   :  { %622 = vmatprep.subr.bf16.mxu1 %v621_v4  ;;  %v631_v35 = vpack.c.bf16 %v91_v31, %v90_v29  ;;  %v633_v36 = vpack.c.bf16 %v125_v33, %v124_v32  ;;  %v109_v38 = vld [vmem:[%s1102_s1 + $0x208] sm:$0xff]  ;;  %v126_v39 = vld [vmem:[%s1102_s1 + $0x290] sm:$0xff]  ;;  %v127_v40 = vld [vmem:[%s1102_s1 + $0x298] sm:$0xff] }
  0x19   :  { %v14_v41 = vld [vmem:[%s1103_s0] sm:$0xff]  ;;  %v635_v42 = vpack.c.bf16 %v109_v38, %v108_v37  ;;  %v16_v43 = vld [vmem:[%s1103_s0 + $0x10] sm:$0xff]  ;;  %v637_v44 = vpack.c.bf16 %v127_v40, %v126_v39  ;;  %v111_v46 = vld [vmem:[%s1102_s1 + $0x218] sm:$0xff] }
  0x1a   :  { %592 = vmatpush3.bf16.msra.mxu0 %v591_v10  ;;  %v110_v45 = vld [vmem:[%s1102_s1 + $0x210] sm:$0xff]  ;;  %v128_v47 = vld [vmem:[%s1102_s1 + $0x2a0] sm:$0xff]  ;;  %v129_v48 = vld [vmem:[%s1102_s1 + $0x2a8] sm:$0xff] }
  0x1b   :  { %624 = vmatpush3.bf16.msra.mxu1 %v623_v13  ;;  %594 = vmatprep.subr.bf16.mxu0 %v593_v14  ;;  %v21_v49 = vld [vmem:[%s1103_s0 + $0x38] sm:$0xff]  ;;  %v639_v50 = vpack.c.bf16 %v111_v46, %v110_v45  ;;  %v20_v51 = vld [vmem:[%s1103_s0 + $0x30] sm:$0xff]  ;;  %v23_v52 = vld [vmem:[%s1103_s0 + $0x48] sm:$0xff]  ;;  %v641_v53 = vpack.c.bf16 %v129_v48, %v128_v47 }
  0x1c   :  { %626 = vmatprep.subr.bf16.mxu1 %v625_v18  ;;  %v112_v54 = vld [vmem:[%s1102_s1 + $0x220] sm:$0xff]  ;;  %v113_v55 = vld [vmem:[%s1102_s1 + $0x228] sm:$0xff]  ;;  %v130_v57 = vld [vmem:[%s1102_s1 + $0x2b0] sm:$0xff] }
  0x1d   :  { %v22_v56 = vld [vmem:[%s1103_s0 + $0x40] sm:$0xff]  ;;  %v131_v58 = vld [vmem:[%s1102_s1 + $0x2b8] sm:$0xff]  ;;  %v27_v59 = vld [vmem:[%s1103_s0 + $0x68] sm:$0xff]  ;;  %v643_v60 = vpack.c.bf16 %v113_v55, %v112_v54 }
  0x1e   :  { %596 = vmatpush3.bf16.msra.mxu0 %v595_v24  ;;  %v26_v61 = vld [vmem:[%s1103_s0 + $0x60] sm:$0xff]  ;;  %v29_v62 = vld [vmem:[%s1103_s0 + $0x78] sm:$0xff]  ;;  %v645_v63 = vpack.c.bf16 %v131_v58, %v130_v57  ;;  %v114_v0 = vld [vmem:[%s1102_s1 + $0x230] sm:$0xff] }
  0x1f   :  { %628 = vmatpush3.bf16.msra.mxu1 %v627_v25  ;;  %598 = vmatprep.subr.bf16.mxu0 %v597_v26  ;;  %v115_v1 = vld [vmem:[%s1102_s1 + $0x238] sm:$0xff]  ;;  %v28_v2 = vld [vmem:[%s1103_s0 + $0x70] sm:$0xff]  ;;  %v132_v3 = vld [vmem:[%s1102_s1 + $0x2c0] sm:$0xff] }
  0x20   :  { %630 = vmatprep.subr.bf16.mxu1 %v629_v30  ;;  %v133_v4 = vld [vmem:[%s1102_s1 + $0x2c8] sm:$0xff]  ;;  %v33_v5 = vld [vmem:[%s1103_s0 + $0x98] sm:$0xff]  ;;  %v647_v6 = vpack.c.bf16 %v115_v1, %v114_v0  ;;  %v32_v7 = vld [vmem:[%s1103_s0 + $0x90] sm:$0xff] }
  0x21   :  { %v35_v8 = vld [vmem:[%s1103_s0 + $0xa8] sm:$0xff]  ;;  %v649_v9 = vpack.c.bf16 %v133_v4, %v132_v3  ;;  %v116_v10 = vld [vmem:[%s1102_s1 + $0x240] sm:$0xff]  ;;  %v134_v13 = vld [vmem:[%s1102_s1 + $0x2d0] sm:$0xff] }
  0x22   :  { %600 = vmatpush3.bf16.msra.mxu0 %v599_v34  ;;  %v117_v11 = vld [vmem:[%s1102_s1 + $0x248] sm:$0xff]  ;;  %v34_v12 = vld [vmem:[%s1103_s0 + $0xa0] sm:$0xff]  ;;  %v135_v14 = vld [vmem:[%s1102_s1 + $0x2d8] sm:$0xff] }
  0x23   :  { %632 = vmatpush3.bf16.msra.mxu1 %v631_v35  ;;  %634 = vmatprep.subr.bf16.mxu0 %v633_v36  ;;  %v39_v15 = vld [vmem:[%s1103_s0 + $0xc8] sm:$0xff]  ;;  %v651_v16 = vpack.c.bf16 %v117_v11, %v116_v10  ;;  %v38_v17 = vld [vmem:[%s1103_s0 + $0xc0] sm:$0xff]  ;;  %v41_v18 = vld [vmem:[%s1103_s0 + $0xd8] sm:$0xff]  ;;  %v653_v19 = vpack.c.bf16 %v135_v14, %v134_v13 }
  0x24   :  { %665 = vmatprep.subr.bf16.mxu1 %v633_v36  ;;  %v118_v20 = vld [vmem:[%s1102_s1 + $0x250] sm:$0xff]  ;;  %v119_v21 = vld [vmem:[%s1102_s1 + $0x258] sm:$0xff]  ;;  %v136_v23 = vld [vmem:[%s1102_s1 + $0x2e0] sm:$0xff] }
  0x25   :  { %212 = vmatmul.mubr.f32.vlgmr.msra.gmra.mrb[0].mxu0 %v14_v41  ;;  %v40_v22 = vld [vmem:[%s1103_s0 + $0xd0] sm:$0xff]  ;;  %v137_v24 = vld [vmem:[%s1102_s1 + $0x2e8] sm:$0xff]  ;;  %v655_v26 = vpack.c.bf16 %v119_v21, %v118_v20  ;;  %v37_v27 = vld [vmem:[%s1103_s0 + $0xb8] sm:$0xff] }
  0x26   :  { %302 = vmatmul.mubr.f32.vlgmr.msra.gmra.mrb[0].mxu1 %v16_v43  ;;  %636 = vmatpush3.bf16.msra.mxu0 %v635_v42  ;;  %v19_v25 = vld [vmem:[%s1103_s0 + $0x28] sm:$0xff]  ;;  %v657_v28 = vpack.c.bf16 %v137_v24, %v136_v23  ;;  %v120_v29 = vld [vmem:[%s1102_s1 + $0x260] sm:$0xff]  ;;  %v138_v31 = vld [vmem:[%s1102_s1 + $0x2f0] sm:$0xff] }
  0x27   :  { %673 = vmatpush3.bf16.msra.mxu1 %v635_v42  ;;  %638 = vmatprep.subr.bf16.mxu0 %v637_v44  ;;  %v121_v30 = vld [vmem:[%s1102_s1 + $0x268] sm:$0xff]  ;;  %v139_v32 = vld [vmem:[%s1102_s1 + $0x2f8] sm:$0xff]  ;;  %v122_v35 = vld [vmem:[%s1102_s1 + $0x270] sm:$0xff] }
  0x28   :  { %666 = vmatprep.subr.bf16.mxu1 %v637_v44  ;;  %216 = vmatprep.mubr.f32.mxu0 %v21_v49  ;;  %v659_v33 = vpack.c.bf16 %v121_v30, %v120_v29  ;;  %v661_v34 = vpack.c.bf16 %v139_v32, %v138_v31  ;;  %v123_v36 = vld [vmem:[%s1102_s1 + $0x278] sm:$0xff]  ;;  %v18_v38 = vld [vmem:[%s1103_s0 + $0x20] sm:$0xff]  ;;  %v36_v39 = vld [vmem:[%s1103_s0 + $0xb0] sm:$0xff] }
  0x29   :  { %217 = vmatmul.mubr.f32.gmra.mrb[2].mxu0 %v20_v51  ;;  %306 = vmatprep.mubr.f32.mxu1 %v23_v52  ;;  %v663_v37 = vpack.c.bf16 %v123_v36, %v122_v35  ;;  %v25_v40 = vld [vmem:[%s1103_s0 + $0x58] sm:$0xff]  ;;  %v43_v41 = vld [vmem:[%s1103_s0 + $0xe8] sm:$0xff]  ;;  %v24_v42 = vld [vmem:[%s1103_s0 + $0x50] sm:$0xff] }
  0x2a   :  { %640 = vmatpush3.bf16.msra.mxu0 %v639_v50  ;;  %307 = vmatmul.mubr.f32.gmra.mrb[2].mxu1 %v22_v56  ;;  %v42_v43 = vld [vmem:[%s1103_s0 + $0xe0] sm:$0xff]  ;;  %v31_v44 = vld [vmem:[%s1103_s0 + $0x88] sm:$0xff] }
  0x2b   :  { %674 = vmatpush3.bf16.msra.mxu1 %v639_v50  ;;  %642 = vmatprep.subr.bf16.mxu0 %v641_v53  ;;  %v30_v45 = vld [vmem:[%s1103_s0 + $0x80] sm:$0xff] }
  0x2c   :  { %667 = vmatprep.subr.bf16.mxu1 %v641_v53  ;;  %221 = vmatprep.mubr.f32.mxu0 %v27_v59  ;;  %v427_v47 = vld [vmem:[%s1104_s2] ss:$0 sm:$0xff] }
  0x2d   :  { %222 = vmatmul.mubr.f32.gmra.mrb[4].mxu0 %v26_v61  ;;  %311 = vmatprep.mubr.f32.mxu1 %v29_v62 }
  0x2e   :  { %644 = vmatpush3.bf16.msra.mxu0 %v643_v60  ;;  %312 = vmatmul.mubr.f32.gmra.mrb[4].mxu1 %v28_v2 }
  0x2f   :  { %675 = vmatpush3.bf16.msra.mxu1 %v643_v60  ;;  %646 = vmatprep.subr.bf16.mxu0 %v645_v63 }
  0x30   :  { %668 = vmatprep.subr.bf16.mxu1 %v645_v63  ;;  %226 = vmatprep.mubr.f32.mxu0 %v33_v5 }
  0x31   :  { %227 = vmatmul.mubr.f32.gmra.mrb[6].mxu0 %v32_v7  ;;  %316 = vmatprep.mubr.f32.mxu1 %v35_v8 }
  0x32   :  { %648 = vmatpush3.bf16.msra.mxu0 %v647_v6  ;;  %317 = vmatmul.mubr.f32.gmra.mrb[6].mxu1 %v34_v12 }
  0x33   :  { %676 = vmatpush3.bf16.msra.mxu1 %v647_v6  ;;  %650 = vmatprep.subr.bf16.mxu0 %v649_v9 }
  0x34   :  { %669 = vmatprep.subr.bf16.mxu1 %v649_v9  ;;  %231 = vmatprep.mubr.f32.mxu0 %v39_v15 }
  0x35   :  { %232 = vmatmul.mubr.f32.gmra.mrb[8].mxu0 %v38_v17  ;;  %321 = vmatprep.mubr.f32.mxu1 %v41_v18 }
  0x36   :  { %652 = vmatpush3.bf16.msra.mxu0 %v651_v16  ;;  %322 = vmatmul.mubr.f32.gmra.mrb[8].mxu1 %v40_v22 }
  0x37   :  { %677 = vmatpush3.bf16.msra.mxu1 %v651_v16  ;;  %654 = vmatprep.subr.bf16.mxu0 %v653_v19 }
  0x38   :  { %670 = vmatprep.subr.bf16.mxu1 %v653_v19  ;;  %391 = vmatprep.mubr.f32.mxu0 %v19_v25 }
  0x39   :  { %406 = vmatprep.mubr.f32.mxu1 %v37_v27 }
  0x3a   :  { %656 = vmatpush3.bf16.msra.mxu0 %v655_v26 }
  0x3b   :  { %678 = vmatpush3.bf16.msra.mxu1 %v655_v26  ;;  %658 = vmatprep.subr.bf16.mxu0 %v657_v28 }
  0x3c   :  { %671 = vmatprep.subr.bf16.mxu1 %v657_v28 }
  0x3e   :  { %660 = vmatpush3.bf16.msra.mxu0 %v659_v33 }
  0x3f   :  { %679 = vmatpush3.bf16.msra.mxu1 %v659_v33  ;;  %662 = vmatprep.subr.bf16.mxu0 %v661_v34 }
  0x40   :  { %672 = vmatprep.subr.bf16.mxu1 %v661_v34 }
  0x42   :  { %664 = vmatpush3.bf16.msra.mxu0 %v663_v37 }
  0x43   :  { %680 = vmatpush3.bf16.msra.mxu1 %v663_v37 }
  0x45   :  { %392 = vmatmul.mubr.f32.vlgmr.msra.gmra.mrb[10].mxu0 %v18_v38 }
  0x46   :  { %407 = vmatmul.mubr.f32.vlgmr.msra.gmra.mrb[10].mxu1 %v36_v39  ;;  %396 = vmatprep.mubr.f32.mxu0 %v25_v40 }
  0x47   :  { %411 = vmatprep.mubr.f32.mxu1 %v43_v41 }
  0x49   :  { %397 = vmatmul.mubr.f32.gmra.mrb[12].mxu0 %v24_v42 }
  0x4a   :  { %412 = vmatmul.mubr.f32.gmra.mrb[12].mxu1 %v42_v43  ;;  %401 = vmatprep.mubr.f32.mxu0 %v31_v44 }
  0x4d   :  { %402 = vmatmul.mubr.f32.gmra.mrb[14].mxu0 %v30_v45 }
  0xf8   :  { %v460_v46 = vpop.f32.mrb[0].mxu0 }
  0xf9   :  { %v461_v48 = vpop.f32.mrb[1].mxu0  ;;  %v507_v49 = vpop.f32.mrb[0].mxu1 }
  0xfa   :  { %v462_v50 = vadd.f32 %v461_v48, %v460_v46  ;;  %v508_v51 = vpop.f32.mrb[1].mxu1 }
  0xfb   :  { %v509_v52 = vadd.f32 %v508_v51, %v507_v49 }
  0xfc   :  { %v214_v53 = vadd.f32 %v462_v50, %v427_v47  ;;  %v463_v54 = vpop.f32.mrb[2].mxu0 }
  0xfd   :  { %v464_v55 = vpop.f32.mrb[3].mxu0  ;;  %v510_v56 = vpop.f32.mrb[2].mxu1 }
  0xfe   :  { %v304_v57 = vadd.f32 %v509_v52, %v214_v53  ;;  %v465_v58 = vadd.f32 %v464_v55, %v463_v54  ;;  %v511_v59 = vpop.f32.mrb[3].mxu1 }
  0xff   :  { %v512_v60 = vadd.f32 %v511_v59, %v510_v56 }
 0x100   :  { %v219_v61 = vadd.f32 %v465_v58, %v427_v47  ;;  %v466_v62 = vpop.f32.mrb[4].mxu0 }
 0x101   :  { %v467_v63 = vpop.f32.mrb[5].mxu0  ;;  %v513_v0 = vpop.f32.mrb[4].mxu1 }
 0x102   :  { %v309_v1 = vadd.f32 %v512_v60, %v219_v61  ;;  %v468_v2 = vadd.f32 %v467_v63, %v466_v62  ;;  %v514_v3 = vpop.f32.mrb[5].mxu1 }
 0x103   :  { %v515_v4 = vadd.f32 %v514_v3, %v513_v0 }
 0x104   :  { %v224_v5 = vadd.f32 %v468_v2, %v427_v47  ;;  %v469_v6 = vpop.f32.mrb[6].mxu0 }
 0x105   :  { %v470_v7 = vpop.f32.mrb[7].mxu0  ;;  %v516_v8 = vpop.f32.mrb[6].mxu1 }
 0x106   :  { %v314_v9 = vadd.f32 %v515_v4, %v224_v5  ;;  %v471_v10 = vadd.f32 %v470_v7, %v469_v6  ;;  %v517_v11 = vpop.f32.mrb[7].mxu1 }
 0x107   :  { %v518_v12 = vadd.f32 %v517_v11, %v516_v8 }
 0x108   :  { %v229_v13 = vadd.f32 %v471_v10, %v427_v47  ;;  %v472_v14 = vpop.f32.mrb[8].mxu0 }
 0x109   :  { %v473_v15 = vpop.f32.mrb[9].mxu0  ;;  %v519_v16 = vpop.f32.mrb[8].mxu1 }
 0x10a   :  { %v319_v17 = vadd.f32 %v518_v12, %v229_v13  ;;  %v474_v18 = vadd.f32 %v473_v15, %v472_v14  ;;  %v520_v19 = vpop.f32.mrb[9].mxu1 }
 0x10b   :  { %v521_v20 = vadd.f32 %v520_v19, %v519_v16 }
 0x10c   :  { %v234_v21 = vadd.f32 %v474_v18, %v427_v47 }
 0x10e   :  { %v324_v22 = vadd.f32 %v521_v20, %v234_v21 }
 0x118   :  { %v554_v23 = vpop.f32.mrb[10].mxu0 }
 0x119   :  { %v563_v24 = vpop.f32.mrb[10].mxu1  ;;  %v555_v25 = vpop.f32.mrb[11].mxu0 }
 0x11a   :  { %v556_v26 = vadd.f32 %v555_v25, %v554_v23  ;;  %v564_v27 = vpop.f32.mrb[11].mxu1 }
 0x11b   :  { %v565_v28 = vadd.f32 %v564_v27, %v563_v24 }
 0x11c   :  { %v394_v29 = vadd.f32 %v556_v26, %v304_v57  ;;  %v557_v30 = vpop.f32.mrb[12].mxu0 }
 0x11d   :  { %v409_v31 = vadd.f32 %v565_v28, %v319_v17  ;;  %v566_v32 = vpop.f32.mrb[12].mxu1  ;;  %v558_v33 = vpop.f32.mrb[13].mxu0 }
 0x11e   :  { %418 = vst.msk [vmem:[%s1105_s3] sm:$0xff] %vm417_vm0, %v394_v29  ;;  %v559_v34 = vadd.f32 %v558_v33, %v557_v30  ;;  %v567_v35 = vpop.f32.mrb[13].mxu1 }
 0x11f   :  { %421 = vst.msk [vmem:[%s1105_s3 + $0x18] sm:$0xff] %vm417_vm0, %v409_v31  ;;  %v568_v36 = vadd.f32 %v567_v35, %v566_v32 }
 0x120   :  { %v399_v37 = vadd.f32 %v559_v34, %v309_v1  ;;  %v560_v38 = vpop.f32.mrb[14].mxu0 }
 0x121   :  { %v414_v39 = vadd.f32 %v568_v36, %v324_v22  ;;  %v561_v40 = vpop.f32.mrb[15].mxu0 }
 0x122   :  { %419 = vst.msk [vmem:[%s1105_s3 + $0x8] sm:$0xff] %vm417_vm0, %v399_v37  ;;  %v562_v41 = vadd.f32 %v561_v40, %v560_v38 }
 0x123   :  { %422 = vst.msk [vmem:[%s1105_s3 + $0x20] sm:$0xff] %vm417_vm0, %v414_v39 }
 0x124   :  { %v404_v42 = vadd.f32 %v562_v41, %v314_v9 }
 0x126   :  { %420 = vst.msk [vmem:[%s1105_s3 + $0x10] sm:$0xff] %vm417_vm0, %v404_v42 }

</bundles_post_ra>
